<compile_context>
chip_gen: v7x
topology: tpu7x:2x2x1
jax: 0.10.0
libtpu: 0.0.40
codegen_flags: <defaults>
</compile_context>

<pallas_src>
import functools

import jax
import jax.numpy as jnp
import numpy as np
from jax import lax
from jax.experimental import pallas as pl
from jax.experimental.pallas import tpu as pltpu


def _fire_kernel(H, W, x_ref, wsq_ref, bsq_ref, wcb_ref, bcb_ref, mask_ref,
                 o_ref, col_ref):
    # x_ref:   (B, Cin, HW_pad)  bf16
    # wsq_ref: (Cs, Cin) bf16,  bsq_ref: (Cs, 1) f32
    # wcb_ref: (2*Ce, 9*Cs) bf16, bcb_ref: (2*Ce, 1) f32
    # mask_ref:(9, HW_pad) f32 border-mask table (per 3x3 tap)
    # o_ref:   (B, 2*Ce, HW_pad) f32
    # col_ref: (9*Cs, HW_pad) bf16 VMEM scratch (im2col, reused per image)
    B = x_ref.shape[0]
    Cs = wsq_ref.shape[0]
    HW_pad = x_ref.shape[-1]

    masks = mask_ref[...]                                   # tiny, load once

    for b in range(B):                                      # B is small & static
        # ---- squeeze 1x1 conv + ReLU (channels x spatial matmul, f32 epilogue)
        s = jnp.dot(wsq_ref[...], x_ref[b],
                    preferred_element_type=jnp.float32)     # (Cs, HW_pad) f32
        s = jnp.maximum(s + bsq_ref[...], 0.0)

        # ---- im2col straight into the bf16 scratch: 9 XLU lane-rolls + masks.
        t = 0
        for dy in (-1, 0, 1):
            for dx in (-1, 0, 1):
                if dy == 0 and dx == 0:
                    col_ref[pl.ds(t * Cs, Cs), :] = s.astype(jnp.bfloat16)
                else:
                    delta = dy * W + dx
                    shifted = pltpu.roll(s, shift=(-delta) % HW_pad, axis=1)
                    col_ref[pl.ds(t * Cs, Cs), :] = (
                        shifted * masks[t:t + 1, :]).astype(jnp.bfloat16)
                t += 1

        # ---- fused [expand1x1; expand3x3]: one (2*Ce, 9*Cs) x (9*Cs, HW) MXU
        # pass, result is already channel-concatenated -> single lane-dense store.
        e = jnp.dot(wcb_ref[...], col_ref[...],
                    preferred_element_type=jnp.float32)     # (2*Ce, HW_pad)
        o_ref[b] = jnp.maximum(e + bcb_ref[...], 0.0).astype(o_ref.dtype)


def _pick_batch(N, Cin, Ce, HW_pad):
    """Images per grid step: amortize per-step overhead while keeping the
    double-buffered block well under v7x's 64 MiB VMEM and >=2 grid steps."""
    per_img = (Cin * 2 + 2 * Ce * 4) * HW_pad        # bf16 in + f32 out bytes
    budget = 24 * 1024 * 1024                        # x2 buffering -> ~48 MiB peak
    b = max(1, min(N, budget // max(1, 2 * per_img)))
    if N > 1:
        b = min(b, max(1, N // 2))                   # feed both v7x TensorCores
    while N % b:
        b -= 1
    return b


def fire_module_pallas(x_nchw, params, *, batch_per_step=None,
                       out_dtype=jnp.float32):
    """x_nchw: (N, Cin, H, W) f32. params in PyTorch Conv2d (OIHW) layout.
    Returns (N, 2*Ce, H, W) in out_dtype, concat order [expand1x1, expand3x3]."""
    wsq, bsq, we1, be1, we3, be3 = params
    N, Cin, H, W = x_nchw.shape
    Cs = wsq.shape[0]
    Ce = we1.shape[0]
    HW = H * W
    HW_pad = ((HW + 127) // 128) * 128               # lane-dense stores

    # bf16 activations at the HBM boundary (free trailing-dim reshape, no
    # transpose); compute epilogues stay f32 inside the kernel.
    x2 = x_nchw.reshape(N, Cin, HW).astype(jnp.bfloat16)
    if HW_pad != HW:
        x2 = jnp.pad(x2, ((0, 0), (0, 0), (0, HW_pad - HW)))

    # ---- weight packing (tiny, one-time) -------------------------------------
    wsq2 = wsq.reshape(Cs, Cin).astype(jnp.bfloat16)
    bsq2 = bsq.reshape(Cs, 1).astype(jnp.float32)
    # Combined expand weight: rows [0, Ce) = expand1x1 at the centre tap
    # (columns [4*Cs, 5*Cs)), rows [Ce, 2*Ce) = expand3x3 with taps ordered
    # (kh, kw) to match the im2col layout.
    we3p = jnp.transpose(we3, (0, 2, 3, 1)).reshape(Ce, 9 * Cs)
    wcomb = jnp.zeros((2 * Ce, 9 * Cs), jnp.float32)
    wcomb = wcomb.at[:Ce, 4 * Cs:5 * Cs].set(we1.reshape(Ce, Cs))
    wcomb = wcomb.at[Ce:, :].set(we3p)
    wcomb = wcomb.astype(jnp.bfloat16)
    bcomb = jnp.concatenate([be1, be3]).reshape(2 * Ce, 1).astype(jnp.float32)

    # Per-tap border masks (H, W static -> precomputed on host once).
    lane = np.arange(HW_pad)
    xi, yi = lane % W, lane // W
    rows = []
    for dy in (-1, 0, 1):
        for dx in (-1, 0, 1):
            rows.append((xi + dx >= 0) & (xi + dx < W) &
                        (yi + dy >= 0) & (yi + dy < H) & (lane < HW))
    masks = jnp.asarray(np.stack(rows).astype(np.float32))   # (9, HW_pad)

    if batch_per_step is None:
        batch_per_step = _pick_batch(N, Cin, Ce, HW_pad)
    B = batch_per_step
    assert N % B == 0, (N, B)

    full = lambda a: pl.BlockSpec(a.shape, lambda n: (0,) * a.ndim)

    out = pl.pallas_call(
        functools.partial(_fire_kernel, H, W),
        out_shape=jax.ShapeDtypeStruct((N, 2 * Ce, HW_pad), out_dtype),
        grid_spec=pltpu.PrefetchScalarGridSpec(
            num_scalar_prefetch=0,
            grid=(N // B,),
            in_specs=[
                pl.BlockSpec((B, Cin, HW_pad), lambda n: (n, 0, 0)),
                full(wsq2), full(bsq2),
                full(wcomb), full(bcomb),
                full(masks),
            ],
            out_specs=pl.BlockSpec((B, 2 * Ce, HW_pad), lambda n: (n, 0, 0)),
            scratch_shapes=[pltpu.VMEM((9 * Cs, HW_pad), jnp.bfloat16)],
        ),
        compiler_params=pltpu.CompilerParams(
            dimension_semantics=("parallel",),
            # Above v5e's 16 MiB scoped default, with headroom under v7x's
            # 64 MiB physical VMEM; _pick_batch keeps blocks within this.
            vmem_limit_bytes=48 * 1024 * 1024),
    )(x2, wsq2, bsq2, wcomb, bcomb, masks)

    if HW_pad != HW:
        out = out[..., :HW]
    return out.reshape(N, 2 * Ce, H, W)


def fire_module_ref(x_nchw, params):
    """Pure-JAX reference with PyTorch (NCHW / OIHW) conv semantics."""
    wsq, bsq, we1, be1, we3, be3 = params
    dn = ('NCHW', 'OIHW', 'NCHW')
    s = lax.conv_general_dilated(x_nchw, wsq, (1, 1), 'VALID',
                                 dimension_numbers=dn) + bsq[None, :, None, None]
    s = jnp.maximum(s, 0.0)
    e1 = lax.conv_general_dilated(s, we1, (1, 1), 'VALID',
                                  dimension_numbers=dn) + be1[None, :, None, None]
    e3 = lax.conv_general_dilated(s, we3, (1, 1), ((1, 1), (1, 1)),
                                  dimension_numbers=dn) + be3[None, :, None, None]
    return jnp.maximum(jnp.concatenate([e1, e3], axis=1), 0.0)


def make_params(key, in_channels, squeeze_channels, expand_channels):
    """Parameters in PyTorch Conv2d layout: weight (O, I, kh, kw), bias (O,)."""
    ks = jax.random.split(key, 6)
    scale = 0.1
    wsq = scale * jax.random.normal(ks[0], (squeeze_channels, in_channels, 1, 1), jnp.float32)
    bsq = scale * jax.random.normal(ks[1], (squeeze_channels,), jnp.float32)
    we1 = scale * jax.random.normal(ks[2], (expand_channels, squeeze_channels, 1, 1), jnp.float32)
    be1 = scale * jax.random.normal(ks[3], (expand_channels,), jnp.float32)
    we3 = scale * jax.random.normal(ks[4], (expand_channels, squeeze_channels, 3, 3), jnp.float32)
    be3 = scale * jax.random.normal(ks[5], (expand_channels,), jnp.float32)
    return wsq, bsq, we1, be1, we3, be3


if __name__ == "__main__":
    N, Cin, H, W = 2, 4, 16, 16
    squeeze_channels, expand_channels = 8, 16

    key = jax.random.PRNGKey(0)
    kx, kp = jax.random.split(key)
    x = jax.random.normal(kx, (N, Cin, H, W), jnp.float32)
    params = make_params(kp, Cin, squeeze_channels, expand_channels)

    out = jax.jit(fire_module_pallas)(x, params)
    out = jax.block_until_ready(out)

    ref = jax.block_until_ready(fire_module_ref(x, params))
    assert out.shape == (N, 2 * expand_channels, H, W), out.shape
    # bf16 MXU operands inside the kernel -> loosened tolerance vs f32 reference.
    np.testing.assert_allclose(np.asarray(out), np.asarray(ref), atol=2e-2, rtol=2e-2)

    print("KERNEL_OK")
</pallas_src>

<mosaic_0001>
module attributes {stable_mosaic.version = 11 : i64} {
  func.func @_fire_kernel(%arg0: i32, %arg1: memref<1x4x256xbf16, #tpu.memory_space<vmem>>, %arg2: memref<8x4xbf16, #tpu.memory_space<vmem>>, %arg3: memref<8x1xf32, #tpu.memory_space<vmem>>, %arg4: memref<32x72xbf16, #tpu.memory_space<vmem>>, %arg5: memref<32x1xf32, #tpu.memory_space<vmem>>, %arg6: memref<9x256xf32, #tpu.memory_space<vmem>>, %arg7: memref<1x32x256xf32, #tpu.memory_space<vmem>>, %arg8: memref<72x256xbf16, #tpu.memory_space<vmem>>) attributes {dimension_semantics = [#tpu.dimension_semantics<parallel>], iteration_bounds = array<i64: 2>, scalar_prefetch = 0 : i64, scratch_operands = 1 : i64, tpu.core_type = #tpu.core_type<tc>, window_params = [{transform_indices = @transform_0, window_bounds = array<i64: 1, 4, 256>}, {pipeline_mode = #tpu.pipeline_mode<synchronous>, transform_indices = @transform_1, window_bounds = array<i64: 8, 4>}, {pipeline_mode = #tpu.pipeline_mode<synchronous>, transform_indices = @transform_2, window_bounds = array<i64: 8, 1>}, {pipeline_mode = #tpu.pipeline_mode<synchronous>, transform_indices = @transform_3, window_bounds = array<i64: 32, 72>}, {pipeline_mode = #tpu.pipeline_mode<synchronous>, transform_indices = @transform_4, window_bounds = array<i64: 32, 1>}, {pipeline_mode = #tpu.pipeline_mode<synchronous>, transform_indices = @transform_5, window_bounds = array<i64: 9, 256>}, {transform_indices = @transform_6, window_bounds = array<i64: 1, 32, 256>}]} {
    %c0 = arith.constant 0 : index
    %c0_0 = arith.constant 0 : index
    %0 = vector.load %arg6[%c0, %c0_0] : memref<9x256xf32, #tpu.memory_space<vmem>>, vector<9x256xf32>
    %c0_1 = arith.constant 0 : index
    %c0_2 = arith.constant 0 : index
    %1 = vector.load %arg2[%c0_1, %c0_2] : memref<8x4xbf16, #tpu.memory_space<vmem>>, vector<8x4xbf16>
    %c0_3 = arith.constant 0 : index
    %c0_4 = arith.constant 0 : index
    %c0_5 = arith.constant 0 : index
    %2 = vector.load %arg1[%c0_3, %c0_4, %c0_5] : memref<1x4x256xbf16, #tpu.memory_space<vmem>>, vector<1x4x256xbf16>
    %3 = vector.shape_cast %2 : vector<1x4x256xbf16> to vector<4x256xbf16>
    %cst = arith.constant dense<0.000000e+00> : vector<8x256xf32>
    %4 = tpu.matmul %1, %3, %cst {dimension_numbers = #tpu.dot_dimension_numbers<[1], [0], [0], [1], [0, 0, 1, 1], [], []>} : vector<8x4xbf16>, vector<4x256xbf16>, vector<8x256xf32> -> vector<8x256xf32>
    %c0_6 = arith.constant 0 : index
    %c0_7 = arith.constant 0 : index
    %5 = vector.load %arg3[%c0_6, %c0_7] : memref<8x1xf32, #tpu.memory_space<vmem>>, vector<8x1xf32>
    %6 = vector.broadcast %5 : vector<8x1xf32> to vector<8x256xf32>
    %7 = arith.addf %4, %6 : vector<8x256xf32>
    %cst_8 = arith.constant 0.000000e+00 : f32
    %8 = vector.broadcast %cst_8 : f32 to vector<8x256xf32>
    %9 = arith.maximumf %7, %8 : vector<8x256xf32>
    %c17_i32 = arith.constant 17 : i32
    %10 = tpu.dynamic_rotate %9 by %c17_i32 dim 1 : vector<8x256xf32>, i32 -> vector<8x256xf32>
    %11 = vector.extract_strided_slice %0 {offsets = [0, 0], sizes = [1, 256], strides = [1, 1]} : vector<9x256xf32> to vector<1x256xf32>
    %12 = vector.broadcast %11 : vector<1x256xf32> to vector<8x256xf32>
    %13 = arith.mulf %10, %12 : vector<8x256xf32>
    %14 = arith.truncf %13 : vector<8x256xf32> to vector<8x256xbf16>
    %c0_9 = arith.constant 0 : index
    %c0_10 = arith.constant 0 : index
    %15 = vector.load %arg8[%c0_9, %c0_10] : memref<72x256xbf16, #tpu.memory_space<vmem>>, vector<8x256xbf16>
    tpu.vector_store %arg8[%c0_9, %c0_10], %14 {strides = array<i32>} : memref<72x256xbf16, #tpu.memory_space<vmem>>, vector<8x256xbf16>,
    %c16_i32 = arith.constant 16 : i32
    %16 = tpu.dynamic_rotate %9 by %c16_i32 dim 1 : vector<8x256xf32>, i32 -> vector<8x256xf32>
    %17 = vector.extract_strided_slice %0 {offsets = [1, 0], sizes = [1, 256], strides = [1, 1]} : vector<9x256xf32> to vector<1x256xf32>
    %18 = vector.broadcast %17 : vector<1x256xf32> to vector<8x256xf32>
    %19 = arith.mulf %16, %18 : vector<8x256xf32>
    %20 = arith.truncf %19 : vector<8x256xf32> to vector<8x256xbf16>
    %c8 = arith.constant 8 : index
    %c0_11 = arith.constant 0 : index
    %21 = vector.load %arg8[%c8, %c0_11] : memref<72x256xbf16, #tpu.memory_space<vmem>>, vector<8x256xbf16>
    tpu.vector_store %arg8[%c8, %c0_11], %20 {strides = array<i32>} : memref<72x256xbf16, #tpu.memory_space<vmem>>, vector<8x256xbf16>,
    %c15_i32 = arith.constant 15 : i32
    %22 = tpu.dynamic_rotate %9 by %c15_i32 dim 1 : vector<8x256xf32>, i32 -> vector<8x256xf32>
    %23 = vector.extract_strided_slice %0 {offsets = [2, 0], sizes = [1, 256], strides = [1, 1]} : vector<9x256xf32> to vector<1x256xf32>
    %24 = vector.broadcast %23 : vector<1x256xf32> to vector<8x256xf32>
    %25 = arith.mulf %22, %24 : vector<8x256xf32>
    %26 = arith.truncf %25 : vector<8x256xf32> to vector<8x256xbf16>
    %c16 = arith.constant 16 : index
    %c0_12 = arith.constant 0 : index
    %27 = vector.load %arg8[%c16, %c0_12] : memref<72x256xbf16, #tpu.memory_space<vmem>>, vector<8x256xbf16>
    tpu.vector_store %arg8[%c16, %c0_12], %26 {strides = array<i32>} : memref<72x256xbf16, #tpu.memory_space<vmem>>, vector<8x256xbf16>,
    %c1_i32 = arith.constant 1 : i32
    %28 = tpu.dynamic_rotate %9 by %c1_i32 dim 1 : vector<8x256xf32>, i32 -> vector<8x256xf32>
    %29 = vector.extract_strided_slice %0 {offsets = [3, 0], sizes = [1, 256], strides = [1, 1]} : vector<9x256xf32> to vector<1x256xf32>
    %30 = vector.broadcast %29 : vector<1x256xf32> to vector<8x256xf32>
    %31 = arith.mulf %28, %30 : vector<8x256xf32>
    %32 = arith.truncf %31 : vector<8x256xf32> to vector<8x256xbf16>
    %c24 = arith.constant 24 : index
    %c0_13 = arith.constant 0 : index
    %33 = vector.load %arg8[%c24, %c0_13] : memref<72x256xbf16, #tpu.memory_space<vmem>>, vector<8x256xbf16>
    tpu.vector_store %arg8[%c24, %c0_13], %32 {strides = array<i32>} : memref<72x256xbf16, #tpu.memory_space<vmem>>, vector<8x256xbf16>,
    %34 = arith.truncf %9 : vector<8x256xf32> to vector<8x256xbf16>
    %c32 = arith.constant 32 : index
    %c0_14 = arith.constant 0 : index
    %35 = vector.load %arg8[%c32, %c0_14] : memref<72x256xbf16, #tpu.memory_space<vmem>>, vector<8x256xbf16>
    tpu.vector_store %arg8[%c32, %c0_14], %34 {strides = array<i32>} : memref<72x256xbf16, #tpu.memory_space<vmem>>, vector<8x256xbf16>,
    %c255_i32 = arith.constant 255 : i32
    %36 = tpu.dynamic_rotate %9 by %c255_i32 dim 1 : vector<8x256xf32>, i32 -> vector<8x256xf32>
    %37 = vector.extract_strided_slice %0 {offsets = [5, 0], sizes = [1, 256], strides = [1, 1]} : vector<9x256xf32> to vector<1x256xf32>
    %38 = vector.broadcast %37 : vector<1x256xf32> to vector<8x256xf32>
    %39 = arith.mulf %36, %38 : vector<8x256xf32>
    %40 = arith.truncf %39 : vector<8x256xf32> to vector<8x256xbf16>
    %c40 = arith.constant 40 : index
    %c0_15 = arith.constant 0 : index
    %41 = vector.load %arg8[%c40, %c0_15] : memref<72x256xbf16, #tpu.memory_space<vmem>>, vector<8x256xbf16>
    tpu.vector_store %arg8[%c40, %c0_15], %40 {strides = array<i32>} : memref<72x256xbf16, #tpu.memory_space<vmem>>, vector<8x256xbf16>,
    %c241_i32 = arith.constant 241 : i32
    %42 = tpu.dynamic_rotate %9 by %c241_i32 dim 1 : vector<8x256xf32>, i32 -> vector<8x256xf32>
    %43 = vector.extract_strided_slice %0 {offsets = [6, 0], sizes = [1, 256], strides = [1, 1]} : vector<9x256xf32> to vector<1x256xf32>
    %44 = vector.broadcast %43 : vector<1x256xf32> to vector<8x256xf32>
    %45 = arith.mulf %42, %44 : vector<8x256xf32>
    %46 = arith.truncf %45 : vector<8x256xf32> to vector<8x256xbf16>
    %c48 = arith.constant 48 : index
    %c0_16 = arith.constant 0 : index
    %47 = vector.load %arg8[%c48, %c0_16] : memref<72x256xbf16, #tpu.memory_space<vmem>>, vector<8x256xbf16>
    tpu.vector_store %arg8[%c48, %c0_16], %46 {strides = array<i32>} : memref<72x256xbf16, #tpu.memory_space<vmem>>, vector<8x256xbf16>,
    %c240_i32 = arith.constant 240 : i32
    %48 = tpu.dynamic_rotate %9 by %c240_i32 dim 1 : vector<8x256xf32>, i32 -> vector<8x256xf32>
    %49 = vector.extract_strided_slice %0 {offsets = [7, 0], sizes = [1, 256], strides = [1, 1]} : vector<9x256xf32> to vector<1x256xf32>
    %50 = vector.broadcast %49 : vector<1x256xf32> to vector<8x256xf32>
    %51 = arith.mulf %48, %50 : vector<8x256xf32>
    %52 = arith.truncf %51 : vector<8x256xf32> to vector<8x256xbf16>
    %c56 = arith.constant 56 : index
    %c0_17 = arith.constant 0 : index
    %53 = vector.load %arg8[%c56, %c0_17] : memref<72x256xbf16, #tpu.memory_space<vmem>>, vector<8x256xbf16>
    tpu.vector_store %arg8[%c56, %c0_17], %52 {strides = array<i32>} : memref<72x256xbf16, #tpu.memory_space<vmem>>, vector<8x256xbf16>,
    %c239_i32 = arith.constant 239 : i32
    %54 = tpu.dynamic_rotate %9 by %c239_i32 dim 1 : vector<8x256xf32>, i32 -> vector<8x256xf32>
    %55 = vector.extract_strided_slice %0 {offsets = [8, 0], sizes = [1, 256], strides = [1, 1]} : vector<9x256xf32> to vector<1x256xf32>
    %56 = vector.broadcast %55 : vector<1x256xf32> to vector<8x256xf32>
    %57 = arith.mulf %54, %56 : vector<8x256xf32>
    %58 = arith.truncf %57 : vector<8x256xf32> to vector<8x256xbf16>
    %c64 = arith.constant 64 : index
    %c0_18 = arith.constant 0 : index
    %59 = vector.load %arg8[%c64, %c0_18] : memref<72x256xbf16, #tpu.memory_space<vmem>>, vector<8x256xbf16>
    tpu.vector_store %arg8[%c64, %c0_18], %58 {strides = array<i32>} : memref<72x256xbf16, #tpu.memory_space<vmem>>, vector<8x256xbf16>,
    %c0_19 = arith.constant 0 : index
    %c0_20 = arith.constant 0 : index
    %60 = vector.load %arg4[%c0_19, %c0_20] : memref<32x72xbf16, #tpu.memory_space<vmem>>, vector<32x72xbf16>
    %c0_21 = arith.constant 0 : index
    %c0_22 = arith.constant 0 : index
    %61 = vector.load %arg8[%c0_21, %c0_22] : memref<72x256xbf16, #tpu.memory_space<vmem>>, vector<72x256xbf16>
    %cst_23 = arith.constant dense<0.000000e+00> : vector<32x256xf32>
    %62 = tpu.matmul %60, %61, %cst_23 {dimension_numbers = #tpu.dot_dimension_numbers<[1], [0], [0], [1], [0, 0, 1, 1], [], []>} : vector<32x72xbf16>, vector<72x256xbf16>, vector<32x256xf32> -> vector<32x256xf32>
    %c0_24 = arith.constant 0 : index
    %c0_25 = arith.constant 0 : index
    %63 = vector.load %arg5[%c0_24, %c0_25] : memref<32x1xf32, #tpu.memory_space<vmem>>, vector<32x1xf32>
    %64 = vector.broadcast %63 : vector<32x1xf32> to vector<32x256xf32>
    %65 = arith.addf %62, %64 : vector<32x256xf32>
    %cst_26 = arith.constant 0.000000e+00 : f32
    %66 = vector.broadcast %cst_26 : f32 to vector<32x256xf32>
    %67 = arith.maximumf %65, %66 : vector<32x256xf32>
    %c0_27 = arith.constant 0 : index
    %c0_28 = arith.constant 0 : index
    %c0_29 = arith.constant 0 : index
    %68 = vector.load %arg7[%c0_27, %c0_28, %c0_29] : memref<1x32x256xf32, #tpu.memory_space<vmem>>, vector<1x32x256xf32>
    %69 = vector.shape_cast %68 : vector<1x32x256xf32> to vector<32x256xf32>
    %70 = vector.shape_cast %67 : vector<32x256xf32> to vector<1x32x256xf32>
    tpu.vector_store %arg7[%c0_27, %c0_28, %c0_29], %70 {strides = array<i32>} : memref<1x32x256xf32, #tpu.memory_space<vmem>>, vector<1x32x256xf32>,
    return
  }
  func.func @transform_0(%arg0: i32) -> (i32, i32, i32) {
    %c0_i32 = arith.constant 0 : i32
    %c0_i32_0 = arith.constant 0 : i32
    %c0_i32_1 = arith.constant 0 : i32
    return %arg0, %c0_i32, %c0_i32_0 : i32, i32, i32
  }
  func.func @transform_1(%arg0: i32) -> (i32, i32) {
    %c0_i32 = arith.constant 0 : i32
    %c0_i32_0 = arith.constant 0 : i32
    %c0_i32_1 = arith.constant 0 : i32
    return %c0_i32, %c0_i32_0 : i32, i32
  }
  func.func @transform_2(%arg0: i32) -> (i32, i32) {
    %c0_i32 = arith.constant 0 : i32
    %c0_i32_0 = arith.constant 0 : i32
    %c0_i32_1 = arith.constant 0 : i32
    return %c0_i32, %c0_i32_0 : i32, i32
  }
  func.func @transform_3(%arg0: i32) -> (i32, i32) {
    %c0_i32 = arith.constant 0 : i32
    %c0_i32_0 = arith.constant 0 : i32
    %c0_i32_1 = arith.constant 0 : i32
    return %c0_i32, %c0_i32_0 : i32, i32
  }
  func.func @transform_4(%arg0: i32) -> (i32, i32) {
    %c0_i32 = arith.constant 0 : i32
    %c0_i32_0 = arith.constant 0 : i32
    %c0_i32_1 = arith.constant 0 : i32
    return %c0_i32, %c0_i32_0 : i32, i32
  }
  func.func @transform_5(%arg0: i32) -> (i32, i32) {
    %c0_i32 = arith.constant 0 : i32
    %c0_i32_0 = arith.constant 0 : i32
    %c0_i32_1 = arith.constant 0 : i32
    return %c0_i32, %c0_i32_0 : i32, i32
  }
  func.func @transform_6(%arg0: i32) -> (i32, i32, i32) {
    %c0_i32 = arith.constant 0 : i32
    %c0_i32_0 = arith.constant 0 : i32
    %c0_i32_1 = arith.constant 0 : i32
    return %arg0, %c0_i32, %c0_i32_0 : i32, i32, i32
  }
}

</mosaic_0001>

<bundles_post_ra>
// kernel: fire_module_pallas.1
= control target key start
LH: loop header
LB: loop body
LE: loop exit
PB: predicated region body
PF: predicated region fallthrough
CT: control target
= control target key end

     0   :  { %s921_s21 = smov 0   ;;  %s1049_s0 = inlined_call_operand.vmem [shape: bf16[2,4,256], index: 0, kind: input, shape index: {}]   ;;  %s1050_s1 = inlined_call_operand.vmem [shape: bf16[8,4], index: 1, kind: input, shape index: {}]   ;;  %s1051_s2 = inlined_call_operand.vmem [shape: f32[8,1], index: 2, kind: input, shape index: {}]   ;;  %s1052_s3 = inlined_call_operand.vmem [shape: bf16[32,72], index: 3, kind: input, shape index: {}]   ;;  %s1053_s4 = inlined_call_operand.vmem [shape: f32[32,1], index: 4, kind: input, shape index: {}]   ;;  %s1054_s5 = inlined_call_operand.vmem [shape: f32[9,256], index: 5, kind: input, shape index: {}]   ;;  %s1055_s6 = inlined_call_operand.vmem [shape: f32[2,32,256], index: 6, kind: output, shape index: {}]  }
   0x1 LB: > { %s777_s22 = sadd.s32 4294967295, %s875_s21   ;;  %p781_p0 = scmp.ge.s32.totalorder %s875_s21, 1  ;;  %s875_s21 = sphi %s921_s21, %s16_s21  }
   0x2   : > { %p212_p1 = scmp.lt.s32.totalorder %s875_s21, 3 }
   0x4   : > { %p213_p2 = pnand %p781_p0, %p212_p1 }
   0x5   : > { %p242_p3 = scmp.lt.s32.totalorder (!%p213_p2), %s777_s22, 1  ;;  %v877_v0 = vmov (!%p213_p2), 0   ;;  %v259_v1 = vld [vmem:[%s1051_s2] sm:$0xff] (!%p213_p2)  ;;  %vm278_vm0 = vcmask (!%p213_p2), 1041408   ;;  %vm274_vm1 = vcmask (!%p213_p2), 31744   ;;  %s878_s7 = smov (!%p213_p2), 16   ;;  %v332_v19 = vlaneseq (!%p213_p2) }
   0x6   : > { %216 = sbr.rel (%p213_p2) target bundleno = 611 (0x263), region = 44  ;;  %317 = vmatprep.mubr.bf16.mxu0 (!%p213_p2), %v877_v0  ;;  %865 = vset.pattern.permute.xlu0 (!%p213_p2), %v877_v0  ;;  %v257_v5 = vld [vmem:[%s1050_s1] sm:$0xf] (!%p213_p2)  ;;  %s879_s8 = smov (!%p213_p2), 17   ;;  %v561_v15 = vld [vmem:[%s1053_s4 + $0x8] sm:$0xff] (!%p213_p2)  ;;  %v563_v16 = vld [vmem:[%s1053_s4 + $0x18] sm:$0xff] (!%p213_p2) }
   0x7   : > { %262 = vperm.xlu0 (!%p213_p2), %865, %v259_v1   ;;  %695 = vmatprep.mubr.bf16.mxu1 (!%p213_p2), %v877_v0  ;;  %s880_s9 = smov (!%p213_p2), 15   ;;  %s881_s10 = smov (!%p213_p2), 1   ;;  %v560_v17 = vld [vmem:[%s1053_s4] sm:$0xff] (!%p213_p2)  ;;  %v562_v18 = vld [vmem:[%s1053_s4 + $0x10] sm:$0xff] (!%p213_p2)  ;;  %v973_v22 = vshrl.u32 (!%p213_p2), %v332_v19, 7  ;;  %v975_v23 = vand.u32 (!%p213_p2), 127, %v332_v19 }
   0x8   : > { %866 = vset.pattern.permute.xlu1 (!%p213_p2), %v877_v0  ;;  %s882_s11 = smov (!%p213_p2), 127   ;;  %s883_s12 = smov (!%p213_p2), 113   ;;  %v981_v27 = vld [vmem:[%s1054_s5] sm:$0xff] (!%p213_p2)  ;;  %v986_v28 = vld [vmem:[%s1054_s5 + $0x8] sm:$0xff] (!%p213_p2)  ;;  %vm646_vm10 = vcmask (!%p213_p2), 1043456   ;;  %vm639_vm11 = vcmask (!%p213_p2), 588800  }
   0x9   : > { %s884_s13 = smov (!%p213_p2), 112   ;;  %s885_s14 = smov (!%p213_p2), 111   ;;  %v365_v25 = vsub.s32 (!%p213_p2), 1, %v973_v22  ;;  %vm360_vm2 = vcmp.lt.s32.totalorder (!%p213_p2), %v975_v23, 16  ;;  %v339_v29 = vsub.s32 (!%p213_p2), 0, %v973_v22  ;;  %v417_v30 = vsub.s32 (!%p213_p2), 3, %v973_v22 }
   0xa   : > { %v391_v31 = vsub.s32 (!%p213_p2), 2, %v973_v22  ;;  %v452_v36 = vsub.s32 (!%p213_p2), 5, %v973_v22  ;;  %vm386_vm3 = vcmp.lt.s32.totalorder (!%p213_p2), %v975_v23, 15  ;;  %vm334_vm4 = vcmp.lt.s32.totalorder (!%p213_p2), %v975_v23, 17 }
   0xb   : > { %v366_v32 = vrot.slane (!%p213_p2), %v981_v27, %v365_v25  ;;  %v370_v33 = vrot.slane (!%p213_p2), %v986_v28, %v365_v25  ;;  %v340_v39 = vrot.slane (!%p213_p2), %v981_v27, %v339_v29  ;;  %v344_v40 = vrot.slane (!%p213_p2), %v986_v28, %v339_v29 }
   0xc   : > { %vm412_vm5 = vcmp.lt.s32.totalorder (!%p213_p2), %v975_v23, 1  ;;  %v422_v41 = vrot.slane (!%p213_p2), %v986_v28, %v417_v30  ;;  %v396_v42 = vrot.slane (!%p213_p2), %v986_v28, %v391_v31  ;;  %v418_v43 = vrot.slane (!%p213_p2), %v981_v27, %v417_v30 }
   0xd   : > { %s1057_s22 = smov (!%p242_p3, %s777_s22), 1  ;;  %vm447_vm6 = vcmp.lt.s32.totalorder %v975_v23, 127  ;;  %v457_v48 = vrot.slane %v986_v28, %v452_v36  ;;  %v392_v57 = vrot.slane %v981_v27, %v391_v31  ;;  %v453_v1 = vrot.slane %v981_v27, %v452_v36 }
   0xe   : > { %s817_s25 = sshll.u32 %s1057_s22, 2  ;;  %vm473_vm7 = vcmp.lt.s32.totalorder %v975_v23, 113  ;;  %vm499_vm8 = vcmp.lt.s32.totalorder %v975_v23, 112  ;;  %vm525_vm9 = vcmp.lt.s32.totalorder %v975_v23, 111 }
   0xf   : > { %s246_s28 = scalar_lea.vmem %s1049_s0, %s817_s25 }
  0x10   : > { %v786_v2 = vld.sshfl [vmem:[%s246_s28] sm:$0x33 pattern:$0x76325410] }
  0x11   : > { %v273_v3 = vcombine.high %v786_v2, %v786_v2  ;;  %v280_v4 = vsel %vm278_vm0, %v786_v2, 0 }
  0x13   : > { %787 = vmatprep.subr.msk.bf16.mxu0 %vm278_vm0, %v273_v3  ;;  %v478_v3 = vsub.s32 6, %v973_v22 }
  0x14   : > { %286 = vmatpush1.bf16.msra.mxu0 %v280_v4 }
  0x17   : > { %788 = vmatmul.mubr.msk.bf16.vlgmr.msra.gmra.mrb[0].mxu0 %vm274_vm1, %v257_v5 }
  0x18   : > { %685 = vmatprep.mubr.bf16.mxu0 %v877_v0 }
  0x86   : > { %v263_v6 = vpop.permute.xlu0 %262 }
  0xea   : > { %v319_v7 = vpop.f32.mrb[0].mxu0 }
  0xeb   : > { %v320_v8 = vadd.f32 %v319_v7, %v263_v6  ;;  %v321_v9 = vpop.f32.mrb[1].mxu0  ;;  %v504_v7 = vsub.s32 7, %v973_v22 }
  0xec   : > { %v323_v10 = vpop.f32.mrb[2].mxu0  ;;  %v322_v12 = vadd.f32 %v321_v9, %v263_v6 }
  0xed   : > { %v941_v11 = vmax.f32 %v320_v8, 0.0  ;;  %v324_v13 = vpop.f32.mrb[3].mxu0  ;;  %v509_v19 = vrot.slane %v986_v28, %v504_v7 }
  0xee   : > { %v945_v14 = vmax.f32 %v322_v12, 0.0 }
  0xef   : > { %356 = vrot.lane.b32.xlu1 %v941_v11, %s878_s7  ;;  %328 = vrot.lane.b32.xlu0 %v941_v11, %s879_s8 }
  0xf3   : > { %382 = vrot.lane.b32.xlu1 %v941_v11, %s880_s9  ;;  %358 = vrot.lane.b32.xlu0 %v945_v14, %s878_s7 }
  0xf7   : > { %408 = vrot.lane.b32.xlu1 %v941_v11, %s881_s10  ;;  %384 = vrot.lane.b32.xlu0 %v945_v14, %s880_s9 }
  0xfb   : > { %330 = vrot.lane.b32.xlu1 %v945_v14, %s879_s8  ;;  %410 = vrot.lane.b32.xlu0 %v945_v14, %s881_s10 }
  0xff   : > { %443 = vrot.lane.b32.xlu1 %v941_v11, %s882_s11  ;;  %445 = vrot.lane.b32.xlu0 %v945_v14, %s882_s11 }
 0x103   : > { %469 = vrot.lane.b32.xlu1 %v941_v11, %s883_s12  ;;  %471 = vrot.lane.b32.xlu0 %v945_v14, %s883_s12 }
 0x107   : > { %495 = vrot.lane.b32.xlu1 %v941_v11, %s884_s13  ;;  %497 = vrot.lane.b32.xlu0 %v945_v14, %s884_s13  ;;  %s818_s13 = sshll.u32 %s1057_s22, 6 }
 0x108   : > { %s251_s16 = scalar_lea.vmem %s1055_s6, %s818_s13 }
 0x10b   : > { %521 = vrot.lane.b32.xlu1 %v941_v11, %s885_s14  ;;  %523 = vrot.lane.b32.xlu0 %v945_v14, %s885_s14 }
 0x10f   : > { %571 = vperm.xlu0 %865, %v561_v15   ;;  %566 = vperm.xlu1 %866, %v560_v17   ;;  %v479_v15 = vrot.slane %v981_v27, %v478_v3 }
 0x113   : > { %581 = vperm.xlu0 %865, %v563_v16   ;;  %576 = vperm.xlu1 %866, %v562_v18   ;;  %v483_v16 = vrot.slane %v986_v28, %v478_v3  ;;  %v505_v18 = vrot.slane %v981_v27, %v504_v7  ;;  %v797_v28 = vld [vmem:[%s1054_s5 + $0x10] ss:$0 sm:$0xff] }
 0x161   : > { %v357_v20 = vpop.permute.xlu1 %356  ;;  %v329_v21 = vpop.permute.xlu0 %328 }
 0x165   : > { %v383_v24 = vpop.permute.xlu1 %382  ;;  %v359_v26 = vpop.permute.xlu0 %358 }
 0x166   : > { %v361_v37 = vsel %vm360_vm2, %v357_v20, %v359_v26  ;;  %v362_v38 = vsel %vm360_vm2, %v359_v26, %v357_v20 }
 0x167   : > { %v371_v44 = vmul.f32 %v366_v32, %v362_v38  ;;  %v372_v45 = vmul.f32 %v370_v33, %v361_v37  ;;  %v798_v32 = vld [vmem:[%s1054_s5 + $0x18] ss:$0 sm:$0xff] }
 0x169   : > { %v409_v34 = vpop.permute.xlu1 %408  ;;  %v385_v35 = vpop.permute.xlu0 %384 }
 0x16a   : > { %v387_v49 = vsel %vm386_vm3, %v383_v24, %v385_v35  ;;  %v388_v58 = vsel %vm386_vm3, %v385_v35, %v383_v24 }
 0x16b   : > { %v398_v59 = vmul.f32 %v396_v42, %v387_v49  ;;  %v397_v8 = vmul.f32 %v392_v57, %v388_v58  ;;  %v867_v42 = vld [vmem:[%s1052_s3] sm:$0xff]  }
 0x16d   : > { %v331_v46 = vpop.permute.xlu1 %330  ;;  %v411_v47 = vpop.permute.xlu0 %410 }
 0x16e   : > { %v335_v50 = vsel %vm334_vm4, %v329_v21, %v331_v46  ;;  %v336_v51 = vsel %vm334_vm4, %v331_v46, %v329_v21  ;;  %v413_v52 = vsel %vm412_vm5, %v409_v34, %v411_v47  ;;  %v414_v55 = vsel %vm412_vm5, %v411_v47, %v409_v34 }
 0x16f   : > { %v345_v53 = vmul.f32 %v340_v39, %v336_v51  ;;  %v346_v54 = vmul.f32 %v344_v40, %v335_v50  ;;  %v424_v56 = vmul.f32 %v422_v41, %v413_v52  ;;  %v423_v0 = vmul.f32 %v418_v43, %v414_v55  ;;  %v868_v43 = vld [vmem:[%s1052_s3 + $0x8] sm:$0xff]  }
 0x171   : > { %v828_v60 = vpack.c.bf16 %v371_v44, %v345_v53  ;;  %v444_v61 = vpop.permute.xlu1 %443  ;;  %v446_v62 = vpop.permute.xlu0 %445  ;;  %v829_v63 = vpack.c.bf16 %v372_v45, %v346_v54  ;;  %v831_v6 = vpack.c.bf16 %v424_v56, %v398_v59  ;;  %v830_v12 = vpack.c.bf16 %v423_v0, %v397_v8 }
 0x172   : > { %v449_v2 = vsel %vm447_vm6, %v446_v62, %v444_v61  ;;  %v448_v4 = vsel %vm447_vm6, %v444_v61, %v446_v62 }
 0x173   : > { %v459_v5 = vmul.f32 %v457_v48, %v449_v2  ;;  %653 = vmatprep.subr.bf16.mxu0 %v829_v63  ;;  %838 = vmatprep.subr.bf16.mxu1 %v829_v63  ;;  %v458_v13 = vmul.f32 %v453_v1, %v448_v4 }
 0x174   : > { %654 = vmatpush1.bf16.msra.mxu0 %v828_v60  ;;  %843 = vmatpush1.bf16.msra.mxu1 %v828_v60 }
 0x175   : > { %v470_v9 = vpop.permute.xlu1 %469  ;;  %655 = vmatprep.subr.bf16.mxu0 %v831_v6  ;;  %839 = vmatprep.subr.bf16.mxu1 %v831_v6  ;;  %v472_v10 = vpop.permute.xlu0 %471  ;;  %v833_v17 = vpack.c.bf16 %v459_v5, %v945_v14  ;;  %v832_v25 = vpack.c.bf16 %v458_v13, %v941_v11 }
 0x176   : > { %v474_v20 = vsel %vm473_vm7, %v470_v9, %v472_v10  ;;  %v475_v21 = vsel %vm473_vm7, %v472_v10, %v470_v9 }
 0x177   : > { %v484_v14 = vmul.f32 %v479_v15, %v474_v20  ;;  %v485_v30 = vmul.f32 %v483_v16, %v475_v21 }
 0x178   : > { %656 = vmatpush1.bf16.msra.mxu0 %v830_v12  ;;  %844 = vmatpush1.bf16.msra.mxu1 %v830_v12 }
 0x179   : > { %v496_v22 = vpop.permute.xlu1 %495  ;;  %657 = vmatprep.subr.bf16.mxu0 %v833_v17  ;;  %840 = vmatprep.subr.bf16.mxu1 %v833_v17  ;;  %v498_v24 = vpop.permute.xlu0 %497 }
 0x17a   : > { %v500_v26 = vsel %vm499_vm8, %v496_v22, %v498_v24  ;;  %v501_v29 = vsel %vm499_vm8, %v498_v24, %v496_v22 }
 0x17b   : > { %v510_v31 = vmul.f32 %v505_v18, %v500_v26  ;;  %v511_v27 = vmul.f32 %v509_v19, %v501_v29 }
 0x17c   : > { %658 = vmatpush1.bf16.msra.mxu0 %v832_v25  ;;  %845 = vmatpush1.bf16.msra.mxu1 %v832_v25 }
 0x17d   : > { %v834_v33 = vpack.c.bf16 %v510_v31, %v484_v14  ;;  %v522_v11 = vpop.permute.xlu1 %521  ;;  %v524_v34 = vpop.permute.xlu0 %523  ;;  %v835_v35 = vpack.c.bf16 %v511_v27, %v485_v30 }
 0x17e   : > { %v526_v36 = vsel %vm525_vm9, %v522_v11, %v524_v34  ;;  %v527_v23 = vsel %vm525_vm9, %v524_v34, %v522_v11 }
 0x17f   : > { %v536_v37 = vmul.f32 %v797_v28, %v526_v36  ;;  %v537_v38 = vmul.f32 %v798_v32, %v527_v23  ;;  %659 = vmatprep.subr.bf16.mxu0 %v835_v35  ;;  %841 = vmatprep.subr.bf16.mxu1 %v835_v35 }
 0x180   : > { %660 = vmatpush1.bf16.msra.mxu0 %v834_v33  ;;  %846 = vmatpush1.bf16.msra.mxu1 %v834_v33 }
 0x181   : > { %v836_v39 = vpack.c.bf16 %v536_v37, %v536_v37  ;;  %v837_v40 = vpack.c.bf16 %v537_v38, %v537_v38 }
 0x183   : > { %812 = vmatprep.subr.msk.bf16.mxu0 %vm646_vm10, %v837_v40  ;;  %842 = vmatprep.subr.msk.bf16.mxu1 %vm646_vm10, %v837_v40  ;;  %v648_v41 = vsel %vm646_vm10, %v836_v39, 0 }
 0x184   : > { %662 = vmatpush1.bf16.msra.mxu0 %v648_v41  ;;  %847 = vmatpush1.bf16.msra.mxu1 %v648_v41 }
 0x187   : > { %813 = vmatmul.mubr.msk.bf16.vlgmr.msra.gmra.mrb[4].mxu0 %vm639_vm11, %v867_v42  ;;  %814 = vmatmul.mubr.msk.bf16.vlgmr.msra.gmra.mrb[0].mxu1 %vm639_vm11, %v868_v43 }
 0x18e   : > { %v567_v44 = vpop.permute.xlu1 %566  ;;  %v572_v45 = vpop.permute.xlu0 %571 }
 0x192   : > { %v577_v46 = vpop.permute.xlu1 %576  ;;  %v582_v47 = vpop.permute.xlu0 %581 }
 0x25a   : > { %v687_v48 = vpop.f32.mrb[4].mxu0  ;;  %v697_v49 = vpop.f32.mrb[0].mxu1 }
 0x25b   : > { %v688_v50 = vadd.f32 %v687_v48, %v567_v44  ;;  %v698_v51 = vadd.f32 %v697_v49, %v577_v46  ;;  %v689_v52 = vpop.f32.mrb[5].mxu0  ;;  %v699_v53 = vpop.f32.mrb[1].mxu1 }
 0x25c   : > { %v690_v54 = vadd.f32 %v689_v52, %v567_v44  ;;  %v700_v55 = vadd.f32 %v699_v53, %v577_v46  ;;  %v691_v56 = vpop.f32.mrb[6].mxu0  ;;  %v701_v57 = vpop.f32.mrb[2].mxu1 }
 0x25d   : > { %v706_v58 = vmax.f32 %v688_v50, 0.0  ;;  %v710_v59 = vmax.f32 %v698_v51, 0.0  ;;  %v692_v60 = vadd.f32 %v691_v56, %v572_v45  ;;  %v702_v61 = vadd.f32 %v701_v57, %v582_v47  ;;  %v693_v62 = vpop.f32.mrb[7].mxu0  ;;  %v703_v63 = vpop.f32.mrb[3].mxu1 }
 0x25e   : > { %v707_v0 = vmax.f32 %v690_v54, 0.0  ;;  %v711_v1 = vmax.f32 %v700_v55, 0.0  ;;  %v694_v2 = vadd.f32 %v693_v62, %v572_v45  ;;  %v704_v3 = vadd.f32 %v703_v63, %v582_v47 }
 0x25f   : > { %714 = vst [vmem:[%s251_s16] sm:$0xff] %v706_v58  ;;  %718 = vst [vmem:[%s251_s16 + $0x20] sm:$0xff] %v710_v59  ;;  %v708_v4 = vmax.f32 %v692_v60, 0.0  ;;  %v712_v5 = vmax.f32 %v702_v61, 0.0 }
 0x260   : > { %715 = vst [vmem:[%s251_s16 + $0x8] sm:$0xff] %v707_v0  ;;  %719 = vst [vmem:[%s251_s16 + $0x28] sm:$0xff] %v711_v1  ;;  %v709_v6 = vmax.f32 %v694_v2, 0.0  ;;  %v713_v7 = vmax.f32 %v704_v3, 0.0 }
 0x261   : > { %716 = vst [vmem:[%s251_s16 + $0x10] sm:$0xff] %v708_v4  ;;  %720 = vst [vmem:[%s251_s16 + $0x30] sm:$0xff] %v712_v5 }
 0x262   : > { %717 = vst [vmem:[%s251_s16 + $0x18] sm:$0xff] %v709_v6  ;;  %721 = vst [vmem:[%s251_s16 + $0x38] sm:$0xff] %v713_v7 }
 0x263 PF: > { %s16_s21 = sadd.s32 1, %s875_s21  }
 0x264   : > { %p13_p4 = scmp.ge.s32.totalorder %s16_s21, 4  }
 0x266   :  { %15 = sbr.rel (!%p13_p4) target bundleno = 1 (0x1), region = 74 }

</bundles_post_ra>
